<compile_context>
chip_gen: v5e
topology: v5e:2x2
jax: 0.10.0
libtpu: 0.0.40
codegen_flags: <defaults>
</compile_context>

<pallas_src>
import math
import functools

import jax
import jax.numpy as jnp
from jax.experimental import pallas as pl
from jax.experimental.pallas import tpu as pltpu

_MIB = 1024 * 1024


# ----------------------------------------------------------------------------
# Generation-aware VMEM planning
# ----------------------------------------------------------------------------
def _vmem_capacity_bytes():
    """Physical VMEM per TensorCore; conservative fallback if query fails."""
    try:
        return int(pltpu.get_tpu_info().vmem_capacity_bytes)
    except Exception:
        return 64 * _MIB  # v7x per-TC value: safe on every generation


def _vmem_plan():
    cap = _vmem_capacity_bytes()
    two_cores = cap <= 64 * _MIB          # heuristic: v7x = 64 MiB/TC, 2 TCs/chip
    if cap >= 96 * _MIB:                  # v5e / v6e: 128 MiB physical
        budget = 48 * _MIB                # per-group footprint target
        vmem_limit = 96 * _MIB
    else:                                 # v7x: leave headroom for Mosaic scratch
        budget = 28 * _MIB
        vmem_limit = 48 * _MIB
    return budget, vmem_limit, two_cores


def _choose_group(BH, per_head_bytes, budget_bytes, two_cores):
    """Largest divisor of BH fitting the VMEM budget, with grid-shape hygiene.

    Single-TC chips (v5e/v6e): keep >= 2 grid steps purely so prefetch overlaps
    compute.  Dual-TC chips (v7x): prefer >= 4 steps and an even grid so both
    cores get balanced work.
    """
    g_vmem = max(1, budget_bytes // max(per_head_bytes, 1))
    g_cap = int(min(BH, g_vmem))
    if two_cores:
        if BH >= 4:
            g_cap = min(g_cap, BH // 4)
        elif BH >= 2:
            g_cap = min(g_cap, BH // 2)
    else:
        if BH >= 2:
            g_cap = min(g_cap, BH // 2)
    g_cap = max(g_cap, 1)

    best, best_even = 1, None
    for d in range(1, g_cap + 1):
        if BH % d == 0:
            best = d
            if (BH // d) % 2 == 0:
                best_even = d
    if two_cores and best_even is not None:
        return best_even
    return best


def _choose_tile_k(Lk):
    """Key-dimension tile for the flash path.

    Only tile for long sequences; tiles are multiples of 128 so the (1, tile_k)
    bias block stays lane-aligned.  Irregular Lk falls back to a full tile.
    """
    if Lk <= 1024:
        return Lk
    for t in (512, 256, 128):
        if Lk % t == 0:
            return t
    return Lk


# ----------------------------------------------------------------------------
# Kernels
# ----------------------------------------------------------------------------
def _attn_full_kernel(*refs, temperature, use_mask, use_bf16):
    """return_attn=True path: materialize the (G, Lq, Lk) attention tile."""
    idx = 0
    q_ref = refs[idx]; idx += 1
    k_ref = refs[idx]; idx += 1
    v_ref = refs[idx]; idx += 1
    bias_ref = None
    if use_mask:
        bias_ref = refs[idx]; idx += 1
    o_ref = refs[idx]; idx += 1
    a_ref = refs[idx]

    q = q_ref[...]            # (G, Lq, D)
    k = k_ref[...]            # (G, Lk, D)
    v = v_ref[...]            # (G, Lk, Dv)

    if use_bf16:
        qs, ks = q, k         # wrapper already cast tiles to bf16
    else:
        qs, ks = q.astype(jnp.float32), k.astype(jnp.float32)

    # Batched QK^T on the MXU; scale applied post-matmul in f32 (works for both
    # operand dtypes, avoids a double-rounding on the bf16 path).
    scores = jnp.einsum('gqd,gkd->gqk', qs, ks,
                        preferred_element_type=jnp.float32)   # (G, Lq, Lk) f32
    scores = scores * jnp.float32(1.0 / temperature)

    if use_mask:
        # Additive bias: 0 valid / -1e9 masked, broadcast (1,1,Lk) -> (G,Lq,Lk).
        scores = scores + bias_ref[...][jnp.newaxis]

    # Numerically stable softmax over the key dimension.
    s_max = jnp.max(scores, axis=-1, keepdims=True)
    p = jnp.exp(scores - s_max)
    denom = jnp.sum(p, axis=-1, keepdims=True)
    # approx=True (EUP vrcp) only on the relaxed-precision path.
    attn = p * pl.reciprocal(denom, approx=use_bf16)           # (G, Lq, Lk) f32

    pv = attn.astype(jnp.bfloat16) if use_bf16 else attn
    vv = v if use_bf16 else v.astype(jnp.float32)
    out = jnp.einsum('gqk,gkd->gqd', pv, vv,
                     preferred_element_type=jnp.float32)       # (G, Lq, Dv)

    o_ref[...] = out.astype(o_ref.dtype)
    a_ref[...] = attn.astype(a_ref.dtype)


def _attn_flash_kernel(*refs, temperature, use_mask, use_bf16):
    """return_attn=False path: Lk-tiled online softmax, normalize after PV."""
    idx = 0
    q_ref = refs[idx]; idx += 1
    k_ref = refs[idx]; idx += 1
    v_ref = refs[idx]; idx += 1
    bias_ref = None
    if use_mask:
        bias_ref = refs[idx]; idx += 1
    o_ref = refs[idx]; idx += 1
    m_sc = refs[idx]; idx += 1
    l_sc = refs[idx]; idx += 1
    acc_sc = refs[idx]

    kj = pl.program_id(1)

    @pl.when(kj == 0)
    def _():
        m_sc[...] = jnp.full_like(m_sc, -jnp.inf)
        l_sc[...] = jnp.zeros_like(l_sc)
        acc_sc[...] = jnp.zeros_like(acc_sc)

    q = q_ref[...]            # (G, Lq, D)
    k = k_ref[...]            # (G, Tk, D)
    v = v_ref[...]            # (G, Tk, Dv)

    if use_bf16:
        qs, ks = q, k
    else:
        qs, ks = q.astype(jnp.float32), k.astype(jnp.float32)

    s = jnp.einsum('gqd,gkd->gqk', qs, ks,
                   preferred_element_type=jnp.float32)         # (G, Lq, Tk)
    s = s * jnp.float32(1.0 / temperature)
    if use_mask:
        s = s + bias_ref[...][jnp.newaxis]

    m_new = jnp.maximum(m_sc[...], jnp.max(s, axis=-1, keepdims=True))
    alpha = jnp.exp(m_sc[...] - m_new)                         # (G, Lq, 1)
    p = jnp.exp(s - m_new)                                     # (G, Lq, Tk)
    l_sc[...] = alpha * l_sc[...] + jnp.sum(p, axis=-1, keepdims=True)

    pv = p.astype(jnp.bfloat16) if use_bf16 else p
    vv = v if use_bf16 else v.astype(jnp.float32)
    acc_sc[...] = alpha * acc_sc[...] + jnp.einsum(
        'gqk,gkd->gqd', pv, vv, preferred_element_type=jnp.float32)
    m_sc[...] = m_new

    @pl.when(kj == pl.num_programs(1) - 1)
    def _():
        # Normalize after PV: Lq*Dv multiplies instead of Lq*Lk.
        o_ref[...] = (acc_sc[...] *
                      pl.reciprocal(l_sc[...], approx=use_bf16)).astype(o_ref.dtype)


# ----------------------------------------------------------------------------
# Wrapper
# ----------------------------------------------------------------------------
def attention(q, k, v, mask=None, temperature=None, *,
              return_attn=True, use_bf16_matmul=False,
              group_size=None, tile_k=None, attn_dtype=None):
    """Pallas equivalent of Attention.forward (eval mode).

    Returns (output, attn) when return_attn=True (matching the PyTorch module),
    otherwise just output (flash-style path, no attention-matrix writeback).
    `use_bf16_matmul=True` DMAs bf16 q/k/v tiles and uses the bf16 MXU path
    (relaxed precision; softmax stays f32).
    """
    B, H, Lq, D = q.shape
    _, _, Lk, Dk = k.shape
    _, _, Lkv, Dv = v.shape
    assert k.shape == (B, H, Lk, D)
    assert Lkv == Lk

    if temperature is None:
        temperature = math.sqrt(D)
    use_mask = mask is not None
    out_dtype = q.dtype
    if attn_dtype is None:
        attn_dtype = q.dtype           # match input dtype (PyTorch semantics)

    BH = B * H
    qf = q.reshape(BH, Lq, D)
    kf = k.reshape(BH, Lk, D)
    vf = v.reshape(BH, Lk, Dv)
    if use_bf16_matmul:
        # Cast in the wrapper so HBM read traffic & VMEM tiles actually shrink.
        qf = qf.astype(jnp.bfloat16)
        kf = kf.astype(jnp.bfloat16)
        vf = vf.astype(jnp.bfloat16)
    in_bytes = jnp.dtype(qf.dtype).itemsize
    out_bytes = jnp.dtype(out_dtype).itemsize

    budget_bytes, vmem_limit, two_cores = _vmem_plan()

    bias = None
    if use_mask:
        m = jnp.asarray(mask, dtype=jnp.float32).reshape(1, Lk)
        bias = jnp.where(m == 0, jnp.float32(-1e9), jnp.float32(0.0))

    if return_attn:
        # ------------------------------------------------------------------
        # Full-attention path (attn matrix is a required output).
        # ------------------------------------------------------------------
        attn_bytes = jnp.dtype(attn_dtype).itemsize
        per_head_bytes = (2 * (Lq * D + Lk * D + Lk * Dv) * in_bytes      # in tiles (x2 buf)
                          + 2 * (Lq * Dv * out_bytes + Lq * Lk * attn_bytes)  # out tiles
                          + 4 * (3 * Lq * Lk + Lq * Dv))                  # f32 temporaries
        if group_size is None:
            G = _choose_group(BH, per_head_bytes, budget_bytes, two_cores)
        else:
            G = int(group_size)
            assert BH % G == 0, "group_size must divide B*H"
        grid = (BH // G,)

        in_specs = [
            pl.BlockSpec((G, Lq, D), lambda i: (i, 0, 0)),
            pl.BlockSpec((G, Lk, D), lambda i: (i, 0, 0)),
            pl.BlockSpec((G, Lk, Dv), lambda i: (i, 0, 0)),
        ]
        inputs = [qf, kf, vf]
        if use_mask:
            in_specs.append(pl.BlockSpec((1, Lk), lambda i: (0, 0)))
            inputs.append(bias)

        out_shape = (
            jax.ShapeDtypeStruct((BH, Lq, Dv), out_dtype),
            jax.ShapeDtypeStruct((BH, Lq, Lk), attn_dtype),
        )
        out_specs = [
            pl.BlockSpec((G, Lq, Dv), lambda i: (i, 0, 0)),
            pl.BlockSpec((G, Lq, Lk), lambda i: (i, 0, 0)),
        ]

        kernel = functools.partial(
            _attn_full_kernel,
            temperature=float(temperature),
            use_mask=use_mask,
            use_bf16=use_bf16_matmul,
        )
        out_f, attn_f = pl.pallas_call(
            kernel,
            out_shape=out_shape,
            grid_spec=pltpu.PrefetchScalarGridSpec(
                num_scalar_prefetch=0,
                grid=grid,
                in_specs=in_specs,
                out_specs=out_specs,
            ),
            compiler_params=pltpu.CompilerParams(
                dimension_semantics=("parallel",),
                vmem_limit_bytes=vmem_limit,
            ),
        )(*inputs)
        return out_f.reshape(B, H, Lq, Dv), attn_f.reshape(B, H, Lq, Lk)

    # ----------------------------------------------------------------------
    # Flash path (no attn writeback): Lk grid axis + online softmax.
    # ----------------------------------------------------------------------
    if tile_k is None:
        Tk = _choose_tile_k(Lk)
    else:
        Tk = int(tile_k)
        assert Lk % Tk == 0, "tile_k must divide Lk"
        assert Tk == Lk or Tk % 128 == 0, "partial tile_k must be a multiple of 128"
    num_kt = Lk // Tk

    per_head_bytes = (2 * (Lq * D + Tk * D + Tk * Dv) * in_bytes   # in tiles (x2 buf)
                      + 2 * Lq * Dv * out_bytes                    # out tiles
                      + 4 * (Lq * Dv + 2 * Lq)                     # f32 scratch m/l/acc
                      + 4 * 3 * Lq * Tk)                           # f32 temporaries
    if group_size is None:
        G = _choose_group(BH, per_head_bytes, budget_bytes, two_cores)
    else:
        G = int(group_size)
        assert BH % G == 0, "group_size must divide B*H"
    grid = (BH // G, num_kt)

    in_specs = [
        pl.BlockSpec((G, Lq, D), lambda i, j: (i, 0, 0)),
        pl.BlockSpec((G, Tk, D), lambda i, j: (i, j, 0)),
        pl.BlockSpec((G, Tk, Dv), lambda i, j: (i, j, 0)),
    ]
    inputs = [qf, kf, vf]
    if use_mask:
        in_specs.append(pl.BlockSpec((1, Tk), lambda i, j: (0, j)))
        inputs.append(bias)

    kernel = functools.partial(
        _attn_flash_kernel,
        temperature=float(temperature),
        use_mask=use_mask,
        use_bf16=use_bf16_matmul,
    )
    out_f = pl.pallas_call(
        kernel,
        out_shape=jax.ShapeDtypeStruct((BH, Lq, Dv), out_dtype),
        grid_spec=pltpu.PrefetchScalarGridSpec(
            num_scalar_prefetch=0,
            grid=grid,
            in_specs=in_specs,
            out_specs=pl.BlockSpec((G, Lq, Dv), lambda i, j: (i, 0, 0)),
            scratch_shapes=[
                pltpu.VMEM((G, Lq, 1), jnp.float32),   # running max
                pltpu.VMEM((G, Lq, 1), jnp.float32),   # running denom
                pltpu.VMEM((G, Lq, Dv), jnp.float32),  # output accumulator
            ],
        ),
        compiler_params=pltpu.CompilerParams(
            dimension_semantics=("parallel", "arbitrary"),
            vmem_limit_bytes=vmem_limit,
        ),
    )(*inputs)
    return out_f.reshape(B, H, Lq, Dv)


# ----------------------------------------------------------------------------
# Reference + tests
# ----------------------------------------------------------------------------
def _reference(q, k, v, mask=None, temperature=None):
    """Pure-JAX reference mirroring the PyTorch forward (eval mode)."""
    if temperature is None:
        temperature = math.sqrt(q.shape[-1])
    attn = jnp.matmul(q / temperature, jnp.swapaxes(k, -2, -1))
    if mask is not None:
        m = jnp.asarray(mask, dtype=jnp.float32).reshape(1, 1, 1, -1)
        attn = jnp.where(m == 0, -1e9, attn)
    attn = jax.nn.softmax(attn, axis=-1)
    out = jnp.matmul(attn, v)
    return out, attn


if __name__ == "__main__":
    key = jax.random.PRNGKey(0)
    kq, kk, kv, kq2, kk2, kv2 = jax.random.split(key, 6)

    B, H, L, D = 2, 4, 8, 32
    q = jax.random.normal(kq, (B, H, L, D), dtype=jnp.float32)
    k = jax.random.normal(kk, (B, H, L, D), dtype=jnp.float32)
    v = jax.random.normal(kv, (B, H, L, D), dtype=jnp.float32)
    # mask of length Lk with a couple of masked-out (0) positions
    mask = jnp.array([1, 1, 1, 1, 0, 1, 1, 0], dtype=jnp.float32)

    out_ref, attn_ref = _reference(q, k, v, mask=mask)

    # 1) masked, precise path with attention output (matches module signature)
    out, attn = attention(q, k, v, mask=mask)
    jax.block_until_ready((out, attn))
    assert jnp.allclose(out, out_ref, atol=1e-5, rtol=1e-5)
    assert jnp.allclose(attn, attn_ref, atol=1e-5, rtol=1e-5)

    # 2) no-mask path (temperature defaults to sqrt(D))
    out2, attn2 = attention(q, k, v)
    jax.block_until_ready((out2, attn2))
    out2_ref, attn2_ref = _reference(q, k, v)
    assert jnp.allclose(out2, out2_ref, atol=1e-5, rtol=1e-5)
    assert jnp.allclose(attn2, attn2_ref, atol=1e-5, rtol=1e-5)

    # 3) output-only flash path (single key tile; no attn HBM writeback)
    out3 = attention(q, k, v, mask=mask, return_attn=False)
    jax.block_until_ready(out3)
    assert jnp.allclose(out3, out_ref, atol=1e-5, rtol=1e-5)

    # 4) output-only flash path with a tiled key axis (online softmax exercised)
    Bl, Hl, Ll, Dl = 1, 2, 256, 32
    ql = jax.random.normal(kq2, (Bl, Hl, Ll, Dl), dtype=jnp.float32)
    kl = jax.random.normal(kk2, (Bl, Hl, Ll, Dl), dtype=jnp.float32)
    vl = jax.random.normal(kv2, (Bl, Hl, Ll, Dl), dtype=jnp.float32)
    out4 = attention(ql, kl, vl, return_attn=False, tile_k=128)
    jax.block_until_ready(out4)
    out4_ref, _ = _reference(ql, kl, vl)
    assert jnp.allclose(out4, out4_ref, atol=1e-5, rtol=1e-5)

    # 5) relaxed-precision bf16 MXU path (tiles cast in wrapper); loose tolerance
    out5, attn5 = attention(q, k, v, mask=mask, use_bf16_matmul=True)
    jax.block_until_ready((out5, attn5))
    assert jnp.allclose(out5, out_ref, atol=1e-1, rtol=1e-1)

    print("KERNEL_OK")
</pallas_src>

<mosaic_0001>
module attributes {stable_mosaic.version = 11 : i64} {
  func.func @_attn_full_kernel(%arg0: i32, %arg1: memref<2x8x32xf32, #tpu.memory_space<vmem>>, %arg2: memref<2x8x32xf32, #tpu.memory_space<vmem>>, %arg3: memref<2x8x32xf32, #tpu.memory_space<vmem>>, %arg4: memref<1x8xf32, #tpu.memory_space<vmem>>, %arg5: memref<2x8x32xf32, #tpu.memory_space<vmem>>, %arg6: memref<2x8x8xf32, #tpu.memory_space<vmem>>) attributes {dimension_semantics = [#tpu.dimension_semantics<parallel>], iteration_bounds = array<i64: 4>, scalar_prefetch = 0 : i64, scratch_operands = 0 : i64, tpu.core_type = #tpu.core_type<tc>, window_params = [{transform_indices = @transform_0, window_bounds = array<i64: 2, 8, 32>}, {transform_indices = @transform_1, window_bounds = array<i64: 2, 8, 32>}, {transform_indices = @transform_2, window_bounds = array<i64: 2, 8, 32>}, {pipeline_mode = #tpu.pipeline_mode<synchronous>, transform_indices = @transform_3, window_bounds = array<i64: 1, 8>}, {transform_indices = @transform_4, window_bounds = array<i64: 2, 8, 32>}, {transform_indices = @transform_5, window_bounds = array<i64: 2, 8, 8>}]} {
    %c0 = arith.constant 0 : index
    %c0_0 = arith.constant 0 : index
    %c0_1 = arith.constant 0 : index
    %0 = vector.load %arg1[%c0, %c0_0, %c0_1] : memref<2x8x32xf32, #tpu.memory_space<vmem>>, vector<2x8x32xf32>
    %c0_2 = arith.constant 0 : index
    %c0_3 = arith.constant 0 : index
    %c0_4 = arith.constant 0 : index
    %1 = vector.load %arg2[%c0_2, %c0_3, %c0_4] : memref<2x8x32xf32, #tpu.memory_space<vmem>>, vector<2x8x32xf32>
    %c0_5 = arith.constant 0 : index
    %c0_6 = arith.constant 0 : index
    %c0_7 = arith.constant 0 : index
    %2 = vector.load %arg3[%c0_5, %c0_6, %c0_7] : memref<2x8x32xf32, #tpu.memory_space<vmem>>, vector<2x8x32xf32>
    "tpu.trace_start"() <{level = 10 : i32, message = "gqd,gkd->gqk"}> : () -> ()
    %cst = arith.constant dense<0.000000e+00> : vector<2x8x8xf32>
    %3 = tpu.matmul %0, %1, %cst {dimension_numbers = #tpu.dot_dimension_numbers<[2], [2], [1], [1], [0, 0, 0, 1, 1, 1], [0], [0]>} : vector<2x8x32xf32>, vector<2x8x32xf32>, vector<2x8x8xf32> -> vector<2x8x8xf32>
    "tpu.trace_stop"() : () -> ()
    %cst_8 = arith.constant 0.176776692 : f32
    %4 = vector.broadcast %cst_8 : f32 to vector<2x8x8xf32>
    %5 = arith.mulf %3, %4 : vector<2x8x8xf32>
    %c0_9 = arith.constant 0 : index
    %c0_10 = arith.constant 0 : index
    %6 = vector.load %arg4[%c0_9, %c0_10] : memref<1x8xf32, #tpu.memory_space<vmem>>, vector<1x8xf32>
    %7 = vector.shape_cast %6 : vector<1x8xf32> to vector<1x1x8xf32>
    %8 = vector.broadcast %7 : vector<1x1x8xf32> to vector<2x8x8xf32>
    %9 = arith.addf %5, %8 : vector<2x8x8xf32>
    %cst_11 = arith.constant dense<0xFF800000> : vector<2x8xf32>
    %10 = vector.multi_reduction <maximumf>, %9, %cst_11 [2] : vector<2x8x8xf32> to vector<2x8xf32>
    %11 = vector.shape_cast %10 : vector<2x8xf32> to vector<2x8x1xf32>
    %12 = vector.broadcast %11 : vector<2x8x1xf32> to vector<2x8x8xf32>
    %13 = arith.subf %9, %12 : vector<2x8x8xf32>
    %14 = math.exp %13 : vector<2x8x8xf32>
    %cst_12 = arith.constant dense<0.000000e+00> : vector<2x8xf32>
    %15 = vector.multi_reduction <add>, %14, %cst_12 [2] : vector<2x8x8xf32> to vector<2x8xf32>
    %16 = vector.shape_cast %15 : vector<2x8xf32> to vector<2x8x1xf32>
    %17 = tpu.reciprocal %16 : vector<2x8x1xf32> -> vector<2x8x1xf32>
    %18 = vector.broadcast %17 : vector<2x8x1xf32> to vector<2x8x8xf32>
    %19 = arith.mulf %14, %18 : vector<2x8x8xf32>
    "tpu.trace_start"() <{level = 10 : i32, message = "gqk,gkd->gqd"}> : () -> ()
    %cst_13 = arith.constant dense<0.000000e+00> : vector<2x8x32xf32>
    %20 = tpu.matmul %19, %2, %cst_13 {dimension_numbers = #tpu.dot_dimension_numbers<[2], [1], [1], [2], [0, 0, 0, 1, 1, 2], [0], [0]>} : vector<2x8x8xf32>, vector<2x8x32xf32>, vector<2x8x32xf32> -> vector<2x8x32xf32>
    "tpu.trace_stop"() : () -> ()
    %c0_14 = arith.constant 0 : index
    %c0_15 = arith.constant 0 : index
    %c0_16 = arith.constant 0 : index
    %21 = vector.load %arg5[%c0_14, %c0_15, %c0_16] : memref<2x8x32xf32, #tpu.memory_space<vmem>>, vector<2x8x32xf32>
    tpu.vector_store %arg5[%c0_14, %c0_15, %c0_16], %20 {strides = array<i32>} : memref<2x8x32xf32, #tpu.memory_space<vmem>>, vector<2x8x32xf32>,
    %c0_17 = arith.constant 0 : index
    %c0_18 = arith.constant 0 : index
    %c0_19 = arith.constant 0 : index
    %22 = vector.load %arg6[%c0_17, %c0_18, %c0_19] : memref<2x8x8xf32, #tpu.memory_space<vmem>>, vector<2x8x8xf32>
    tpu.vector_store %arg6[%c0_17, %c0_18, %c0_19], %19 {strides = array<i32>} : memref<2x8x8xf32, #tpu.memory_space<vmem>>, vector<2x8x8xf32>,
    return
  }
  func.func @transform_0(%arg0: i32) -> (i32, i32, i32) {
    %c0_i32 = arith.constant 0 : i32
    %c0_i32_0 = arith.constant 0 : i32
    %c0_i32_1 = arith.constant 0 : i32
    return %arg0, %c0_i32, %c0_i32_0 : i32, i32, i32
  }
  func.func @transform_1(%arg0: i32) -> (i32, i32, i32) {
    %c0_i32 = arith.constant 0 : i32
    %c0_i32_0 = arith.constant 0 : i32
    %c0_i32_1 = arith.constant 0 : i32
    return %arg0, %c0_i32, %c0_i32_0 : i32, i32, i32
  }
  func.func @transform_2(%arg0: i32) -> (i32, i32, i32) {
    %c0_i32 = arith.constant 0 : i32
    %c0_i32_0 = arith.constant 0 : i32
    %c0_i32_1 = arith.constant 0 : i32
    return %arg0, %c0_i32, %c0_i32_0 : i32, i32, i32
  }
  func.func @transform_3(%arg0: i32) -> (i32, i32) {
    %c0_i32 = arith.constant 0 : i32
    %c0_i32_0 = arith.constant 0 : i32
    %c0_i32_1 = arith.constant 0 : i32
    return %c0_i32, %c0_i32_0 : i32, i32
  }
  func.func @transform_4(%arg0: i32) -> (i32, i32, i32) {
    %c0_i32 = arith.constant 0 : i32
    %c0_i32_0 = arith.constant 0 : i32
    %c0_i32_1 = arith.constant 0 : i32
    return %arg0, %c0_i32, %c0_i32_0 : i32, i32, i32
  }
  func.func @transform_5(%arg0: i32) -> (i32, i32, i32) {
    %c0_i32 = arith.constant 0 : i32
    %c0_i32_0 = arith.constant 0 : i32
    %c0_i32_1 = arith.constant 0 : i32
    return %arg0, %c0_i32, %c0_i32_0 : i32, i32, i32
  }
}

</mosaic_0001>

<bundles_post_ra>
// kernel: tpu_custom_call.1
= control target key start
LH: loop header
LB: loop body
LE: loop exit
PB: predicated region body
PF: predicated region fallthrough
CT: control target
= control target key end

     0   :  { %s1265_s0 = inlined_call_operand.hbm [shape: f32[8,8,32], index: 0, kind: input, shape index: {}]   ;;  %s1266_s1 = inlined_call_operand.hbm [shape: f32[8,8,32], index: 1, kind: input, shape index: {}]   ;;  %s1267_s2 = inlined_call_operand.hbm [shape: f32[8,8,32], index: 2, kind: input, shape index: {}]   ;;  %s1268_s3 = inlined_call_operand.vmem [shape: f32[1,8], index: 3, kind: input, shape index: {}]   ;;  %s1269_s4 = inlined_call_operand.hbm [shape: f32[8,8,32], index: 4, kind: output, shape index: {0}]   ;;  %s1270_s5 = inlined_call_operand.hbm [shape: f32[8,8,8], index: 5, kind: output, shape index: {1}]  }
   0x1   :  { %1277 = sst [smem:[#allocation18_spill]] %s1265_s0 }
   0x2   :  { %1278 = sst [smem:[#allocation19_spill]] %s1266_s1 }
   0x3   :  { %11 = vsyncpa [#allocation3], 0 }
   0x4   :  { %13 = vsyncpa [#allocation3 + $0x1], 0 }
   0x5   :  { %14 = vsyncpa [#allocation6], 0 }
   0x6   :  { %16 = vsyncpa [#allocation6 + $0x1], 0 }
   0x7   :  { %17 = vsyncpa [#allocation4], 0 }
   0x8   :  { %19 = vsyncpa [#allocation4 + $0x1], 0 }
   0x9   :  { %20 = vsyncpa [#allocation10], 0 }
   0xa   :  { %22 = vsyncpa [#allocation10 + $0x1], 0  ;;  %s1034_s18 = smov 0   ;;  %s1036_s19 = smov 0  }
   0xb   :  { %s1038_s20 = smov 0   ;;  %s1040_s21 = smov 0  }
   0xc LB: > { %1279 = sst [smem:[#allocation15_spill]] %s994_s20  ;;  %s1055_s22 = sadd.s32 4294967295, %s998_s21   ;;  %s998_s21 = sphi %s1040_s21, %s1291_s21   ;;  %s994_s20 = sphi %s1038_s20, %s1293_s20   ;;  %s990_s19 = sphi %s1036_s19, %s1295_s19   ;;  %s986_s18 = sphi %s1034_s18, %s1294_s18  }
   0xd   : > { %s695_s23 = sadd.s32 4294967294, %s998_s21   ;;  %s1059_s24 = sadd.s32 1, %s998_s21  }
   0xe   : > { %1280 = sst [smem:[#allocation16_spill]] %s1059_s24  ;;  %s35_s25 = sadd.s32 1, %s994_s20 }
   0xf   : > { %s32_s26 = ssub.s32 %s998_s21, %s1059_s24  ;;  %p42_p0 = scmp.ne.s32.totalorder %s994_s20, %s990_s19 }
  0x10   : > { %p33_p1 = scmp.eq.s32.totalorder %s32_s26, 0  ;;  %p43_p2 = scmp.eq.s32.totalorder %s998_s21, 0 }
  0x11   : > { %p48_p3 = scmp.ne.s32.totalorder %s990_s19, %s986_s18  ;;  %p49_p4 = scmp.eq.s32.totalorder %s1055_s22, 0 }
  0x12   : > { %s1071_s27 = scalar_select %p33_p1, %s994_s20, %s35_s25  }
  0x13   : > { %p44_p5 = por %p43_p2, %p42_p0  ;;  %p1073_p6 = por %p49_p4, %p48_p3 }
  0x14   : > { %1281 = sst [smem:[#allocation17_spill]] %s1071_s27  ;;  %p145_p7 = scmp.eq.s32.totalorder %s1055_s22, 3 }
  0x15   : > { %p151_p8 = scmp.eq.s32.totalorder %s695_s23, 3  ;;  %p759_p9 = scmp.lt.s32.totalorder %s998_s21, 4 }
  0x16   : > { %p1079_p10 = por %p145_p7, %p42_p0  ;;  %s1271_s6 = sand.u32 1, %s994_s20  }
  0x17   : > { %p1083_p11 = por %p151_p8, %p48_p3  ;;  %s1089_s7 = sshll.u32 %s998_s21, 4 }
  0x18   : > { %s1093_s8 = sshll.u32 %s1271_s6, 4  ;;  %p1095_p12 = pnand %p759_p9, %p44_p5 }
  0x19   : > { %s222_s10 = sand.u32 1, %s998_s21   ;;  %s1286_s1 = sld [smem:[#allocation19_spill]] }
  0x1a   : > { %s226_s14 = scalar_lea.vmem [#allocation5], %s1093_s8  ;;  %p707_p13 = scmp.ge.s32.totalorder %s998_s21, 1 }
  0x1b   : > { %s234_s15 = sshll.u32 %s226_s14, 4  ;;  %s1106_s17 = scalar_lea.sflag [#allocation6], %s222_s10  ;;  %s235_s15 = int_to_ptr.vmem [resolvable:$true] %s234_s15 }
  0x1c   : > { %p810_p1 = pneg %p1095_p12 }
  0x1f   : > { %s231_s13 = scalar_lea.hbm %s1286_s1, %s1089_s7  ;;  %s813_s12 = scalar_lea.hbm %s1286_s1, 64 }
  0x20   : > { %s232_s16 = sshll.u32 %s231_s13, 4  ;;  %s233_s16 = int_to_ptr.hbm [resolvable:$true] %s232_s16 }
  0x21   : > { %s806_s23 = sshra.s32 %s233_s16, 4  ;;  %s807_s23 = int_to_ptr.hbm [resolvable:$true] %s806_s23 }
  0x22   : > { %s808_s25 = scalar_lea.hbm %s807_s23, 16  ;;  %p814_p4 = scmp.lt.s32.totalorder %s807_s23, %s1286_s1 }
  0x23   : > { %p809_p0 = scmp.ne.s32.totalorder %s807_s23, %s808_s25  ;;  %p815_p5 = scmp.lt.s32.totalorder %s813_s12, %s808_s25 }
  0x25   : > { %p811_p2 = pnand %p810_p1, %p809_p0  ;;  %p816_p7 = por %p815_p5, %p814_p4 }
  0x27   : > { %p812_p3 = pneg %p811_p2 }
  0x29   : > { %p817_p8 = pnand %p816_p7, %p812_p3 }
  0x2b   : > { %820 = shalt.err (!%p817_p8)
}
  0x2c   : > { %s1274_s10 = smov 128   ;;  %s1001_s6 = smov 8  }
  0x2d   : > { %748 = dma.hbm_to_vmem [thread:$0]  (!%p1095_p12), %s233_s16, 256, %s235_s15, %s1106_s17, %s1274_s10, %s1274_s10, %s1001_s6  }
  0x2e   : > { %p264_p9 = scmp.lt.s32.totalorder %s998_s21, 5  ;;  %s1287_s0 = sld [smem:[#allocation18_spill]] }
  0x2f   : > { %s204_s13 = scalar_lea.vmem [#allocation2], %s1093_s8  ;;  %s1289_s1 = sand.u32 1, %s994_s20  }
  0x30   : > { %p1132_p0 = pnand %p707_p13, %p264_p9  ;;  %s212_s14 = sshll.u32 %s204_s13, 4  ;;  %s213_s14 = int_to_ptr.vmem [resolvable:$true] %s212_s14 }
  0x31   : > { %s201_s27 = scalar_lea.sflag [#allocation3], %s1289_s1 }
  0x34   : > { %s209_s26 = scalar_lea.hbm %s1287_s0, %s1089_s7  ;;  %s843_s25 = scalar_lea.hbm %s1287_s0, 64 }
  0x35   : > { %s210_s12 = sshll.u32 %s209_s26, 4  ;;  %s211_s12 = int_to_ptr.hbm [resolvable:$true] %s210_s12 }
  0x36   : > { %s836_s24 = sshra.s32 %s211_s12, 4  ;;  %s837_s24 = int_to_ptr.hbm [resolvable:$true] %s836_s24 }
  0x37   : > { %s838_s15 = scalar_lea.hbm %s837_s24, 16  ;;  %p844_p13 = scmp.lt.s32.totalorder %s837_s24, %s1287_s0 }
  0x38   : > { %p839_p2 = scmp.ne.s32.totalorder %s837_s24, %s838_s15  ;;  %p845_p5 = scmp.lt.s32.totalorder %s843_s25, %s838_s15 }
  0x3a   : > { %p841_p3 = pnand %p839_p2, %p810_p1  ;;  %p846_p7 = por %p845_p5, %p844_p13 }
  0x3c   : > { %p842_p4 = pneg %p841_p3 }
  0x3e   : > { %p847_p8 = pnand %p846_p7, %p842_p4 }
  0x40   : > { %850 = shalt.err (!%p847_p8)
}
  0x41   : > { %s1290_s1 = smov 128   ;;  %s253_s23 = scalar_lea.hbm %s1267_s2, %s1089_s7 }
  0x42   : > { %745 = dma.hbm_to_vmem [thread:$0]  (!%p1095_p12), %s211_s12, 256, %s213_s14, %s201_s27, %s1290_s1, %s1290_s1, %s1001_s6  }
  0x43   : > { %s248_s20 = scalar_lea.vmem [#allocation7], %s1093_s8  ;;  %s254_s24 = sshll.u32 %s253_s23, 4  ;;  %s255_s24 = int_to_ptr.hbm [resolvable:$true] %s254_s24 }
  0x44   : > { %s256_s10 = sshll.u32 %s248_s20, 4  ;;  %s866_s15 = sshra.s32 %s255_s24, 4  ;;  %s257_s10 = int_to_ptr.vmem [resolvable:$true] %s256_s10  ;;  %s867_s15 = int_to_ptr.hbm [resolvable:$true] %s866_s15 }
  0x45   : > { %s868_s25 = scalar_lea.hbm %s867_s15, 16  ;;  %s873_s27 = scalar_lea.hbm %s1267_s2, 64 }
  0x46   : > { %p869_p9 = scmp.ne.s32.totalorder %s867_s15, %s868_s25  ;;  %p874_p4 = scmp.lt.s32.totalorder %s867_s15, %s1267_s2 }
  0x47   : > { %p875_p13 = scmp.lt.s32.totalorder %s873_s27, %s868_s25 }
  0x48   : > { %p871_p2 = pnand %p869_p9, %p810_p1 }
  0x49   : > { %p876_p5 = por %p875_p13, %p874_p4 }
  0x4a   : > { %p872_p3 = pneg %p871_p2 }
  0x4c   : > { %p877_p7 = pnand %p876_p5, %p872_p3 }
  0x4e   : > { %880 = shalt.err (!%p877_p7)
}
  0x4f   : > { %751 = dma.hbm_to_vmem [thread:$0]  (!%p1095_p12), %s255_s24, 256, %s257_s10, %s1106_s17, %s1290_s1, %s1290_s1, %s1001_s6  }
  0x50   : > { %268 = sbr.rel (%p1132_p0) target bundleno = 630 (0x276), region = 36  ;;  %s1176_s0 = sand.u32 (!%p1132_p0), 1, %s990_s19  }
  0x51   : > { %s1179_s20 = sshll.u32 (!%p1132_p0), %s1176_s0, 4  ;;  %s271_s7 = scalar_lea.sflag (!%p1132_p0), [#allocation3], %s1176_s0 }
  0x52   : > { %s274_s8 = scalar_lea.vmem (!%p1132_p0), [#allocation2], %s1179_s20 }
  0x55   : > { %969 = dma.done.wait (%p1073_p6), %s271_s7, 256  }
  0x56   : > { %971 = vsyncadd (%p1073_p6), %s271_s7, 4294967040  ;;  %s280_s6 = sand.u32 1, %s1055_s22   ;;  %s284_s17 = scalar_lea.vmem [#allocation5], %s1179_s20 }
  0x57   : > { %s281_s9 = scalar_lea.sflag [#allocation6], %s280_s6 }
  0x58   : > { %973 = dma.done.wait (%p1073_p6), %s281_s9, 512  }
  0x59   : > { %975 = vsyncadd (%p1073_p6), %s281_s9, 4294966784  ;;  %vm348_vm0 = vcmask 261120   ;;  %v344_v0 = vld [vmem:[%s284_s17] sm:$0xff]  ;;  %v345_v1 = vld [vmem:[%s284_s17 + $0x8] sm:$0xff]  ;;  %vm409_vm1 = vcmask 64512   ;;  %s294_s28 = scalar_lea.vmem [#allocation7], %s1179_s20 }
  0x5a   : > { %713 = vmatpush.xpose.msk.msra.mxu0 %vm348_vm0, %v344_v0  ;;  %v342_v2 = vld [vmem:[%s274_s8] sm:$0xff]  ;;  %715 = vmatpush.xpose.msk.msra.mxu1 %vm348_vm0, %v345_v1  ;;  %v343_v3 = vld [vmem:[%s274_s8 + $0x8] sm:$0xff]  ;;  %s336_s13 = scalar_lea.vmem [#allocation9], %s1179_s20  ;;  %s730_s16 = sshll.u32 %s1055_s22, 4 }
  0x5b   : > { %v797_v4 = vld [vmem:[%s1268_s3] ss:$0 sm:$0xff]  ;;  %v347_v24 = vld [vmem:[%s294_s28 + $0x8] sm:$0xff]  ;;  %s543_s23 = sshll.u32 %s336_s13, 4  ;;  %s542_s15 = scalar_lea.hbm %s1270_s5, %s730_s16  ;;  %s544_s23 = int_to_ptr.vmem [resolvable:$true] %s543_s23 }
  0x5c   : > { %v346_v23 = vld [vmem:[%s294_s28] sm:$0xff]  ;;  %499 = vmatpush.msra.mxu3 %v347_v24  ;;  %s545_s25 = sshll.u32 %s542_s15, 4  ;;  %s514_s26 = scalar_lea.sflag [#allocation10], %s1176_s0  ;;  %s546_s25 = int_to_ptr.hbm [resolvable:$true] %s545_s25 }
  0x5d   : > { %714 = vmatmul.msk.f32.vlgmr.msra.gmra.mxu0 %vm348_vm0, %v342_v2  ;;  %716 = vmatmul.msk.f32.vlgmr.msra.gmra.mxu1 %vm348_vm0, %v343_v3  ;;  %s910_s27 = sshra.s32 %s546_s25, 4  ;;  %s916_s22 = scalar_lea.hbm %s1270_s5, 64  ;;  %s911_s27 = int_to_ptr.hbm [resolvable:$true] %s910_s27 }
  0x5e   : > { %476 = vmatpush.msra.mxu2 %v346_v23  ;;  %s912_s12 = scalar_lea.hbm %s911_s27, 16  ;;  %p917_p0 = scmp.lt.s32.totalorder %s911_s27, %s1270_s5 }
  0x5f   : > { %p913_p6 = scmp.ne.s32.totalorder %s911_s27, %s912_s12  ;;  %p918_p8 = scmp.lt.s32.totalorder %s916_s22, %s912_s12 }
  0x61   : > { %p914_p12 = pnand %p913_p6, %p1079_p10  ;;  %p919_p9 = por %p918_p8, %p917_p0 }
  0x63   : > { %p915_p1 = pneg %p914_p12 }
  0x65   : > { %p920_p2 = pnand %p919_p9, %p915_p1 }
  0xda   : > { %v372_v5 = vpop.f32.mrf.mxu0  ;;  %v398_v6 = vpop.f32.mrf.mxu1 }
  0xdb   : > { %v401_v7 = vmul.f32 0.17677669, %v372_v5  ;;  %v402_v9 = vmul.f32 0.17677669, %v398_v6 }
  0xdd   : > { %v407_v8 = vadd.f32 %v797_v4, %v401_v7  ;;  %v408_v11 = vadd.f32 %v797_v4, %v402_v9 }
  0xdf   : > { %v410_v10 = vsel %vm409_vm1, %v407_v8, -inf  ;;  %v413_v12 = vsel %vm409_vm1, %v408_v11, -inf }
  0xe0   : > { %411 = vmax.xlane.f32.xlu0 %v410_v10 }
  0xe8   : > { %414 = vmax.xlane.f32.xlu0 %v413_v12 }
 0x153   : > { %v412_v13 = vpop.xlane.xlu0 %411 }
 0x154   : > { %v416_v14 = vsub.f32 %v407_v8, %v412_v13 }
 0x156   : > { %v418_v15 = vmul.f32 1.442695, %v416_v14 }
 0x158   : > { %798 = vpow2.f32 %v418_v15 }
 0x15b   : > { %v415_v16 = vpop.xlane.xlu0 %414 }
 0x15c   : > { %v417_v17 = vsub.f32 %v408_v11, %v415_v16 }
 0x15e   : > { %v799_v18 = vpop.eup %798  ;;  %v420_v19 = vmul.f32 1.442695, %v417_v17 }
 0x15f   : > { %v422_v20 = vsel %vm409_vm1, %v799_v18, 0.0 }
 0x160   : > { %800 = vpow2.f32 %v420_v19  ;;  %423 = vadd.xlane.f32.xlu1 %v422_v20 }
 0x166   : > { %v801_v21 = vpop.eup %800 }
 0x167   : > { %v425_v22 = vsel %vm409_vm1, %v801_v21, 0.0 }
 0x168   : > { %426 = vadd.xlane.f32.xlu1 %v425_v22 }
 0x1d3   : > { %v424_v25 = vpop.xlane.xlu1 %423 }
 0x1d4   : > { %802 = vrcp.f32 %v424_v25  ;;  %v439_v30 = vand.u32 2147483648, %v424_v25  ;;  %v437_v32 = vand.u32 2147483647, %v424_v25  ;;  %vm433_vm3 = vweird.f32 %v424_v25 }
 0x1d6   : > { %v440_v35 = vor.u32 1.1754944e-38, %v439_v30  ;;  %vm438_vm5 = vcmp.eq.f32.partialorder %v437_v32, 8.507059e+37 }
 0x1da   : > { %v803_v26 = vpop.eup %802 }
 0x1db   : > { %v429_v27 = vmul.f32 %v803_v26, %v424_v25  ;;  %v427_v28 = vpop.xlane.xlu1 %426  ;;  %vm434_vm2 = vweird.f32 %v803_v26 }
 0x1dc   : > { %804 = vrcp.f32 %v427_v28  ;;  %vm435_vm4 = vmor %vm433_vm3, %vm434_vm2  ;;  %v453_v41 = vand.u32 2147483648, %v427_v28  ;;  %v451_v43 = vand.u32 2147483647, %v427_v28  ;;  %vm447_vm7 = vweird.f32 %v427_v28 }
 0x1dd   : > { %v430_v29 = vsub.f32 1.0, %v429_v27 }
 0x1de   : > { %v454_v45 = vor.u32 1.1754944e-38, %v453_v41  ;;  %vm452_vm9 = vcmp.eq.f32.partialorder %v451_v43, 8.507059e+37 }
 0x1df   : > { %v431_v31 = vmul.f32 %v803_v26, %v430_v29 }
 0x1e1   : > { %v432_v33 = vadd.f32 %v803_v26, %v431_v31 }
 0x1e2   : > { %v805_v34 = vpop.eup %804 }
 0x1e3   : > { %v443_v36 = vmul.f32 %v805_v34, %v427_v28  ;;  %v436_v37 = vsel %vm435_vm4, %v803_v26, %v432_v33  ;;  %vm448_vm6 = vweird.f32 %v805_v34 }
 0x1e4   : > { %v441_v38 = vsel %vm438_vm5, %v440_v35, %v436_v37  ;;  %vm449_vm8 = vmor %vm447_vm7, %vm448_vm6 }
 0x1e5   : > { %v444_v39 = vsub.f32 1.0, %v443_v36  ;;  %v456_v40 = vmul.f32 %v799_v18, %v441_v38 }
 0x1e7   : > { %v445_v42 = vmul.f32 %v805_v34, %v444_v39  ;;  %717 = vmatmul.msk.f32.vlgmr.msra.gmra.mxu2 %vm409_vm1, %v456_v40  ;;  %506 = vst.msk [vmem:[%s336_s13] sm:$0xff] %vm409_vm1, %v456_v40 }
 0x1e9   : > { %v446_v44 = vadd.f32 %v805_v34, %v445_v42 }
 0x1eb   : > { %v450_v46 = vsel %vm449_vm8, %v805_v34, %v446_v44 }
 0x1ec   : > { %v455_v47 = vsel %vm452_vm9, %v454_v45, %v450_v46 }
 0x1ed   : > { %v457_v48 = vmul.f32 %v801_v21, %v455_v47 }
 0x1ef   : > { %718 = vmatmul.msk.f32.vlgmr.msra.gmra.mxu3 %vm409_vm1, %v457_v48  ;;  %507 = vst.msk [vmem:[%s336_s13 + $0x8] sm:$0xff] %vm409_vm1, %v457_v48 }
 0x1f0   : > { %923 = shalt.err (!%p920_p2)
}
 0x1f1   : > { %s1002_s9 = smov 128   ;;  %s1003_s17 = smov 8  }
 0x1f2   : > { %739 = dma.vmem_to_hbm [thread:$0]  (%p1079_p10), %s544_s23, 256, %s546_s25, %s514_s26, %s1002_s9, %s1002_s9, %s1003_s17  }
 0x1f3   : > { %s329_s11 = scalar_lea.vmem [#allocation8], %s1179_s20  ;;  %s525_s13 = scalar_lea.hbm %s1269_s4, %s730_s16 }
 0x1f4   : > { %s526_s10 = sshll.u32 %s329_s11, 4  ;;  %s528_s24 = sshll.u32 %s525_s13, 4  ;;  %s527_s10 = int_to_ptr.vmem [resolvable:$true] %s526_s10  ;;  %s529_s24 = int_to_ptr.hbm [resolvable:$true] %s528_s24 }
 0x1f5   : > { %s509_s15 = scalar_lea.sflag [#allocation4], %s1176_s0  ;;  %s938_s27 = sshra.s32 %s529_s24, 4  ;;  %s939_s27 = int_to_ptr.hbm [resolvable:$true] %s938_s27 }
 0x1f6   : > { %s940_s23 = scalar_lea.hbm %s939_s27, 16  ;;  %s944_s26 = scalar_lea.hbm %s1269_s4, 64 }
 0x1f7   : > { %p941_p3 = scmp.ne.s32.totalorder %s939_s27, %s940_s23  ;;  %p945_p5 = scmp.lt.s32.totalorder %s939_s27, %s1269_s4 }
 0x1f8   : > { %p946_p7 = scmp.lt.s32.totalorder %s944_s26, %s940_s23 }
 0x1f9   : > { %p942_p4 = pnand %p941_p3, %p1079_p10 }
 0x1fa   : > { %p947_p6 = por %p946_p7, %p945_p5 }
 0x1fb   : > { %p943_p13 = pneg %p942_p4 }
 0x1fd   : > { %p948_p12 = pnand %p947_p6, %p943_p13 }
 0x26a   : > { %v478_v49 = vpop.f32.mrf.mxu2 }
 0x26b   : > { %504 = vst.msk [vmem:[%s329_s11] sm:$0xff] %vm348_vm0, %v478_v49 }
 0x272   : > { %v501_v50 = vpop.f32.mrf.mxu3 }
 0x273   : > { %505 = vst.msk [vmem:[%s329_s11 + $0x8] sm:$0xff] %vm348_vm0, %v501_v50 }
 0x274   : > { %951 = shalt.err (!%p948_p12)
}
 0x275   : > { %738 = dma.vmem_to_hbm [thread:$0]  (%p1079_p10), %s527_s10, 256, %s529_s24, %s509_s15, %s1002_s9, %s1002_s9, %s1003_s17  }
 0x276 PF: > { %p760_p1 = scmp.ge.s32.totalorder %s998_s21, 2  ;;  %s560_s0 = sand.u32 1, %s986_s18  }
 0x277   : > { %s561_s14 = scalar_lea.sflag [#allocation4], %s560_s0 }
 0x278   : > { %p753_p0 = pnand %p760_p1, %p1083_p11 }
 0x27a   : > { %p754_p8 = pneg %p753_p0 }
 0x27c   : > { %977 = dma.done.wait (%p754_p8), %s561_s14, 256  }
 0x27d   : > { %979 = vsyncadd (%p754_p8), %s561_s14, 4294967040  ;;  %s571_s7 = scalar_lea.sflag [#allocation10], %s560_s0 }
 0x27e   : > { %981 = dma.done.wait (%p754_p8), %s571_s7, 256  }
 0x27f   : > { %983 = vsyncadd (%p754_p8), %s571_s7, 4294967040  ;;  %s1291_s21 = sld [smem:[#allocation16_spill]]  ;;  %s1294_s18 = smov %s990_s19 }
 0x280   : > { %s1292_s29 = sld [smem:[#allocation15_spill]] }
 0x281   : > { %s1293_s20 = sld [smem:[#allocation17_spill]] }
 0x285   : > { %p25_p10 = scmp.ge.s32.totalorder %s1291_s21, 6  }
 0x286   : > { %s1295_s19 = smov %s1292_s29 }
 0x287   :  { %27 = sbr.rel (!%p25_p10) target bundleno = 12 (0xc), region = 122 }
 0x28c   :  { %577 = vsyncpa [#allocation3], 1 }
 0x28d   :  { %579 = vsyncpa [#allocation3 + $0x1], 1 }
 0x28e   :  { %580 = vsyncpa [#allocation6], 1 }
 0x28f   :  { %582 = vsyncpa [#allocation6 + $0x1], 1 }
 0x290   :  { %583 = vsyncpa [#allocation4], 1 }
 0x291   :  { %585 = vsyncpa [#allocation4 + $0x1], 1 }
 0x292   :  { %586 = vsyncpa [#allocation10], 1 }
 0x293   :  { %588 = vsyncpa [#allocation10 + $0x1], 1 }

</bundles_post_ra>
